<compile_context>
chip_gen: v5e
topology: v5e:2x2
jax: 0.10.0
libtpu: 0.0.40
codegen_flags: <defaults>
</compile_context>

<pallas_src>
import jax
import jax.numpy as jnp
from jax.experimental import pallas as pl
from jax.experimental.pallas import tpu as pltpu


def dice_kernel(alpha_ref, x_ref, o_ref):
    x = x_ref[...].astype(jnp.float32)           # (B, TH) lane tile, full batch resident
    b = x.shape[0]                               # batch axis is never tiled -> global B

    # Per-column (over batch) mean / unbiased variance (torch.var default, N-1).
    mean = jnp.mean(x, axis=0, keepdims=True)    # (1, TH)
    diff = x - mean
    # torch.var with N == 1 gives 0/0 = NaN; reproduce that instead of a Python
    # ZeroDivisionError at trace time.
    inv_nm1 = jnp.float32(1.0 / (b - 1)) if b > 1 else jnp.float32(float("nan"))
    var = jnp.sum(diff * diff, axis=0, keepdims=True) * inv_nm1
    inv_std = 1.0 / jnp.sqrt(var + jnp.float32(1e-9))   # accurate path; only (1, TH)
    norm_x = diff * inv_std

    # Exact, overflow-safe sigmoid: sigmoid(z) = 0.5 * (1 + tanh(z / 2)).
    # One EUP transcendental per element (vs exp + approx reciprocal + select).
    p = 0.5 * jnp.tanh(0.5 * norm_x) + 0.5

    # Factored blend: alpha*x*(1-p) + x*p == x * (alpha + (1-alpha)*p).
    alpha = alpha_ref[0]                         # f32 scalar from SMEM
    o_ref[...] = (x * (alpha + (1.0 - alpha) * p)).astype(o_ref.dtype)


def _round_down(v, m):
    return (v // m) * m


def _vmem_capacity_bytes():
    # Device-aware clamp (v7x has 64 MiB/TC, v5e/v6e 128 MiB).  Falls back to the
    # smallest (v7x) capacity so the footprint is safe everywhere.
    try:
        return int(pltpu.get_tpu_info().vmem_capacity_bytes)
    except Exception:
        return 64 * 1024 * 1024


def _choose_lane_tile(B, H, itemsize, vmem_cap):
    LANE = 128
    if H <= 2 * LANE:
        # Tiny hidden: single block whose shape equals the full array dims
        # (satisfies the (8,128) rule without any padding); nothing to pipeline.
        return H
    # Per grid step: 2x input + 2x output pipeline buffers (io dtype) plus roughly
    # 3 tile-sized f32 temporaries inside the body.
    budget = (vmem_cap * 3) // 4
    per_lane = B * (4 * itemsize + 3 * 4)
    th_budget = max(LANE, _round_down(budget // per_lane, LANE))
    th = min(2048, th_budget)                                   # diminishing returns past ~2K
    th = max(th, min(512, th_budget))                           # keep >= 512 when VMEM allows
    th = min(th, max(512, _round_down(pl.cdiv(H, 4), LANE)))    # aim for >= 4 grid steps
    th = min(th, max(LANE, _round_down(H // 2, LANE)))          # always >= 2 grid steps
    return max(LANE, min(th, th_budget))


def dice(x, alpha, *, lane_tile=None):
    """Dice activation.  x: (B, H) float32/bfloat16, alpha: (1,) parameter."""
    B, H = x.shape
    itemsize = jnp.dtype(x.dtype).itemsize
    vmem_cap = _vmem_capacity_bytes()
    TH = lane_tile if lane_tile is not None else _choose_lane_tile(B, H, itemsize, vmem_cap)
    n_blocks = pl.cdiv(H, TH)   # trailing partial block is masked by Pallas; no pad/slice

    # TODO(synk): for very large B (a (B, 128) tile alone exceeding the per-step VMEM
    # budget) switch to a two-pass structure (batch-tiled "arbitrary" stats pass, then
    # an apply pass) instead of keeping the whole batch resident.

    per_step_bytes = B * TH * (4 * itemsize + 3 * 4)
    vmem_limit = int(min(vmem_cap, max(32 * 1024 * 1024, per_step_bytes + (8 << 20))))

    alpha = jnp.asarray(alpha, jnp.float32).reshape((1,))

    return pl.pallas_call(
        dice_kernel,
        out_shape=jax.ShapeDtypeStruct((B, H), x.dtype),
        grid_spec=pltpu.PrefetchScalarGridSpec(
            num_scalar_prefetch=0,
            grid=(n_blocks,),
            in_specs=[
                pl.BlockSpec(memory_space=pltpu.SMEM),        # alpha (1,) scalar
                pl.BlockSpec((B, TH), lambda j: (0, j)),      # x lane tile
            ],
            out_specs=pl.BlockSpec((B, TH), lambda j: (0, j)),
        ),
        compiler_params=pltpu.CompilerParams(
            dimension_semantics=("parallel",),
            vmem_limit_bytes=vmem_limit,
        ),
        cost_estimate=pl.CostEstimate(
            flops=10 * B * H,
            transcendentals=B * H,            # one tanh per element
            bytes_accessed=2 * B * H * itemsize,
        ),
    )(alpha, x)


def dice_ref(x, alpha):
    mean = jnp.mean(x, axis=0)
    var = jnp.var(x, axis=0, ddof=1)          # unbiased, matches torch.var
    norm_x = (x - mean) / jnp.sqrt(var + 1e-9)
    p = jax.nn.sigmoid(norm_x)
    return alpha * x * (1 - p) + x * p


if __name__ == "__main__":
    key = jax.random.PRNGKey(0)
    B, H = 8, 32
    x = jax.random.normal(key, (B, H), dtype=jnp.float32)
    # Parameter init matches nn.Parameter(torch.zeros((1,))) deterministically.
    alpha = jnp.zeros((1,), dtype=jnp.float32)

    out = dice(x, alpha)
    jax.block_until_ready(out)

    ref = dice_ref(x, alpha[0])
    assert out.shape == ref.shape and out.dtype == ref.dtype
    max_err = float(jnp.max(jnp.abs(out - ref)))
    assert jnp.allclose(out, ref, atol=1e-4, rtol=1e-4), f"mismatch vs reference (max abs err {max_err})"
    print("KERNEL_OK")
</pallas_src>

<mosaic_0001>
module attributes {stable_mosaic.version = 11 : i64} {
  func.func @dice_kernel(%arg0: i32, %arg1: memref<1xf32, #tpu.memory_space<smem>>, %arg2: memref<8x32xf32, #tpu.memory_space<vmem>>, %arg3: memref<8x32xf32, #tpu.memory_space<vmem>>) attributes {dimension_semantics = [#tpu.dimension_semantics<parallel>], iteration_bounds = array<i64: 1>, scalar_prefetch = 0 : i64, scratch_operands = 0 : i64, tpu.core_type = #tpu.core_type<tc>, window_params = [{transform_indices = @transform_0, window_bounds = array<i64: 1>}, {transform_indices = @transform_1, window_bounds = array<i64: 8, 32>}, {transform_indices = @transform_2, window_bounds = array<i64: 8, 32>}]} {
    %c0 = arith.constant 0 : index
    %c0_0 = arith.constant 0 : index
    %0 = vector.load %arg2[%c0, %c0_0] : memref<8x32xf32, #tpu.memory_space<vmem>>, vector<8x32xf32>
    %cst = arith.constant dense<0.000000e+00> : vector<32xf32>
    %1 = vector.multi_reduction <add>, %0, %cst [0] : vector<8x32xf32> to vector<32xf32>
    %2 = vector.shape_cast %1 : vector<32xf32> to vector<1x32xf32>
    %cst_1 = arith.constant 8.000000e+00 : f32
    %3 = vector.broadcast %cst_1 : f32 to vector<1x32xf32>
    %4 = arith.divf %2, %3 : vector<1x32xf32>
    %5 = vector.broadcast %4 : vector<1x32xf32> to vector<8x32xf32>
    %6 = arith.subf %0, %5 : vector<8x32xf32>
    %7 = arith.mulf %6, %6 : vector<8x32xf32>
    %cst_2 = arith.constant dense<0.000000e+00> : vector<32xf32>
    %8 = vector.multi_reduction <add>, %7, %cst_2 [0] : vector<8x32xf32> to vector<32xf32>
    %9 = vector.shape_cast %8 : vector<32xf32> to vector<1x32xf32>
    %cst_3 = arith.constant 0.142857149 : f32
    %10 = vector.broadcast %cst_3 : f32 to vector<1x32xf32>
    %11 = arith.mulf %9, %10 : vector<1x32xf32>
    %cst_4 = arith.constant 9.99999971E-10 : f32
    %12 = vector.broadcast %cst_4 : f32 to vector<1x32xf32>
    %13 = arith.addf %11, %12 : vector<1x32xf32>
    %14 = math.sqrt %13 : vector<1x32xf32>
    %cst_5 = arith.constant 1.000000e+00 : f32
    %15 = vector.broadcast %cst_5 : f32 to vector<1x32xf32>
    %16 = arith.divf %15, %14 : vector<1x32xf32>
    %17 = vector.broadcast %16 : vector<1x32xf32> to vector<8x32xf32>
    %18 = arith.mulf %6, %17 : vector<8x32xf32>
    %cst_6 = arith.constant 5.000000e-01 : f32
    %19 = vector.broadcast %cst_6 : f32 to vector<8x32xf32>
    %20 = arith.mulf %19, %18 : vector<8x32xf32>
    %21 = math.tanh %20 : vector<8x32xf32>
    %cst_7 = arith.constant 5.000000e-01 : f32
    %22 = vector.broadcast %cst_7 : f32 to vector<8x32xf32>
    %23 = arith.mulf %22, %21 : vector<8x32xf32>
    %cst_8 = arith.constant 5.000000e-01 : f32
    %24 = vector.broadcast %cst_8 : f32 to vector<8x32xf32>
    %25 = arith.addf %23, %24 : vector<8x32xf32>
    %c0_9 = arith.constant 0 : index
    %26 = memref.load %arg1[%c0_9] : memref<1xf32, #tpu.memory_space<smem>>
    %cst_10 = arith.constant 1.000000e+00 : f32
    %27 = arith.subf %cst_10, %26 : f32
    %28 = vector.broadcast %27 : f32 to vector<8x32xf32>
    %29 = arith.mulf %28, %25 : vector<8x32xf32>
    %30 = vector.broadcast %26 : f32 to vector<8x32xf32>
    %31 = arith.addf %30, %29 : vector<8x32xf32>
    %32 = arith.mulf %0, %31 : vector<8x32xf32>
    %c0_11 = arith.constant 0 : index
    %c0_12 = arith.constant 0 : index
    %33 = vector.load %arg3[%c0_11, %c0_12] : memref<8x32xf32, #tpu.memory_space<vmem>>, vector<8x32xf32>
    tpu.vector_store %arg3[%c0_11, %c0_12], %32 {strides = array<i32>} : memref<8x32xf32, #tpu.memory_space<vmem>>, vector<8x32xf32>,
    return
  }
  func.func @transform_0(%arg0: i32) -> i32 {
    %c0_i32 = arith.constant 0 : i32
    %c0_i32_0 = arith.constant 0 : i32
    return %c0_i32 : i32
  }
  func.func @transform_1(%arg0: i32) -> (i32, i32) {
    %c0_i32 = arith.constant 0 : i32
    %c0_i32_0 = arith.constant 0 : i32
    return %c0_i32, %arg0 : i32, i32
  }
  func.func @transform_2(%arg0: i32) -> (i32, i32) {
    %c0_i32 = arith.constant 0 : i32
    %c0_i32_0 = arith.constant 0 : i32
    return %c0_i32, %arg0 : i32, i32
  }
}

</mosaic_0001>

<bundles_post_ra>
// kernel: tpu_custom_call.1
= control target key start
LH: loop header
LB: loop body
LE: loop exit
PB: predicated region body
PF: predicated region fallthrough
CT: control target
= control target key end

     0   :  { %8 = vsyncpa [#allocation4], 0  ;;  %s213_s0 = inlined_call_operand.<no memory space> [shape: f32[1], index: 0, kind: input, shape index: {}]   ;;  %s214_s1 = inlined_call_operand.hbm [shape: f32[8,32], index: 1, kind: input, shape index: {}]   ;;  %s215_s2 = inlined_call_operand.hbm [shape: f32[8,32], index: 2, kind: output, shape index: {}]  }
   0x1   :  { %9 = vsyncpa [#allocation5], 0  ;;  %s17_s11 = sshll.u32 %s214_s1, 4  ;;  %s175_s12 = smov [#allocation3]   ;;  %s18_s11 = int_to_ptr.hbm [resolvable:$true] %s17_s11 }
   0x2   :  { %s19_s13 = sshll.u32 %s175_s12, 4  ;;  %s20_s13 = int_to_ptr.vmem [resolvable:$true] %s19_s13 }
   0x3   :  { %22 = dma.hbm_to_vmem [thread:$0]  %s18_s11, 128, %s20_s13, [#allocation4]  }
   0x4   :  { %171 = dma.done.wait [#allocation4], 128  }
   0x5   :  { %172 = vsyncadd [#allocation4], 4294967168  ;;  %v176_v0 = vmov 8.0   ;;  %vm28_vm0 = vcmask 261120   ;;  %v196_v2 = vld [vmem:[#allocation3] sm:$0xff]  ;;  %s88_s15 = ssub.f32 1.0, %s213_s0  ;;  %v91_v53 = vstv %s213_s0 }
   0x6   :  { %115 = vrcp.f32 %v176_v0  ;;  %v29_v3 = vsel %vm28_vm0, %v196_v2, 0.0  ;;  %s177_s18 = smov [#allocation6]   ;;  %s102_s22 = sshll.u32 %s215_s2, 4  ;;  %s103_s22 = int_to_ptr.hbm [resolvable:$true] %s102_s22 }
   0x7   :  { %v30_v5 = vrot.slane %v29_v3, 4  ;;  %v89_v51 = vstv %s88_s15  ;;  %s100_s19 = sshll.u32 %s177_s18, 4  ;;  %s101_s19 = int_to_ptr.vmem [resolvable:$true] %s100_s19 }
   0x9   :  { %v31_v7 = vadd.f32 %v30_v5, %v29_v3 }
   0xb   :  { %v32_v9 = vrot.slane %v31_v7, 2 }
   0xc   :  { %v116_v1 = vpop.eup %115 }
   0xd   :  { %v37_v4 = vmul.f32 8.0, %v116_v1  ;;  %v33_v11 = vadd.f32 %v32_v9, %v31_v7  ;;  %vm41_vm1 = vweird.f32 %v116_v1 }
   0xf   :  { %v38_v6 = vsub.f32 1.0, %v37_v4  ;;  %v34_v12 = vrot.slane %v33_v11, 1 }
  0x11   :  { %v39_v8 = vmul.f32 %v116_v1, %v38_v6  ;;  %v35_v14 = vadd.f32 %v34_v12, %v33_v11 }
  0x13   :  { %v40_v10 = vadd.f32 %v116_v1, %v39_v8 }
  0x15   :  { %v42_v13 = vsel %vm41_vm1, %v116_v1, %v40_v10 }
  0x16   :  { %v43_v15 = vmul.f32 %v42_v13, %v35_v14 }
  0x18   :  { %v44_v16 = vsub.f32 %v196_v2, %v43_v15 }
  0x1a   :  { %v45_v17 = vmul.f32 %v44_v16, %v44_v16 }
  0x1c   :  { %v46_v18 = vsel %vm28_vm0, %v45_v17, 0.0 }
  0x1d   :  { %v47_v19 = vrot.slane %v46_v18, 4 }
  0x1f   :  { %v48_v20 = vadd.f32 %v47_v19, %v46_v18 }
  0x21   :  { %v49_v21 = vrot.slane %v48_v20, 2 }
  0x23   :  { %v50_v22 = vadd.f32 %v49_v21, %v48_v20 }
  0x25   :  { %v51_v23 = vrot.slane %v50_v22, 1 }
  0x27   :  { %v52_v24 = vadd.f32 %v51_v23, %v50_v22 }
  0x29   :  { %v53_v25 = vmul.f32 0.14285715, %v52_v24 }
  0x2b   :  { %v54_v26 = vadd.f32 1e-09, %v53_v25 }
  0x2d   :  { %117 = vrsqrt.f32 %v54_v26  ;;  %vm62_vm2 = vcmp.eq.f32.partialorder %v54_v26, inf  ;;  %v65_v33 = vand.u32 2147483648, %v54_v26  ;;  %vm64_vm3 = vcmp.eq.f32.partialorder %v54_v26, 0.0 }
  0x33   :  { %v118_v27 = vpop.eup %117 }
  0x34   :  { %v56_v28 = vmul.f32 %v118_v27, %v54_v26 }
  0x36   :  { %v57_v29 = vmul.f32 %v118_v27, %v56_v28 }
  0x38   :  { %v58_v30 = vmul.f32 0.5, %v57_v29 }
  0x3a   :  { %v59_v31 = vsub.f32 1.5, %v58_v30 }
  0x3c   :  { %v60_v32 = vmul.f32 %v118_v27, %v59_v31 }
  0x3e   :  { %v61_v34 = vmul.f32 %v60_v32, %v54_v26 }
  0x40   :  { %v63_v35 = vsel %vm62_vm2, %v54_v26, %v61_v34 }
  0x41   :  { %v66_v36 = vsel %vm64_vm3, %v65_v33, %v63_v35 }
  0x42   :  { %119 = vrcp.f32 %v66_v36  ;;  %v78_v39 = vand.u32 2147483648, %v66_v36  ;;  %vm72_vm4 = vweird.f32 %v66_v36  ;;  %v76_v41 = vand.u32 2147483647, %v66_v36 }
  0x44   :  { %v79_v43 = vor.u32 1.1754944e-38, %v78_v39  ;;  %vm77_vm7 = vcmp.eq.f32.partialorder %v76_v41, 8.507059e+37 }
  0x48   :  { %v120_v37 = vpop.eup %119 }
  0x49   :  { %v68_v38 = vmul.f32 %v120_v37, %v66_v36  ;;  %vm73_vm5 = vweird.f32 %v120_v37 }
  0x4a   :  { %vm74_vm6 = vmor %vm72_vm4, %vm73_vm5 }
  0x4b   :  { %v69_v40 = vsub.f32 1.0, %v68_v38 }
  0x4d   :  { %v70_v42 = vmul.f32 %v120_v37, %v69_v40 }
  0x4f   :  { %v71_v44 = vadd.f32 %v120_v37, %v70_v42 }
  0x51   :  { %v75_v45 = vsel %vm74_vm6, %v120_v37, %v71_v44 }
  0x52   :  { %v80_v46 = vsel %vm77_vm7, %v79_v43, %v75_v45 }
  0x53   :  { %v82_v47 = vmul.f32 %v80_v46, %v44_v16 }
  0x55   :  { %v83_v48 = vmul.f32 0.5, %v82_v47 }
  0x57   :  { %121 = vtanh.f32 %v83_v48 }
  0x5d   :  { %v122_v49 = vpop.eup %121 }
  0x5e   :  { %v85_v50 = vmul.f32 0.5, %v122_v49 }
  0x60   :  { %v86_v52 = vadd.f32 0.5, %v85_v50 }
  0x62   :  { %v90_v54 = vmul.f32 %v89_v51, %v86_v52 }
  0x64   :  { %v92_v55 = vadd.f32 %v91_v53, %v90_v54 }
  0x66   :  { %v93_v56 = vmul.f32 %v92_v55, %v196_v2 }
  0x68   :  { %94 = vst.msk [vmem:[#allocation6] sm:$0xff] %vm28_vm0, %v93_v56 }
  0x69   :  { %105 = dma.vmem_to_hbm [thread:$0]  %s101_s19, 128, %s103_s22, [#allocation5]  }
  0x6a   :  { %173 = dma.done.wait [#allocation5], 128  }
  0x6b   :  { %174 = vsyncadd [#allocation5], 4294967168 }
  0x6c   :  { %110 = vsyncpa [#allocation4], 1 }
  0x6d   :  { %111 = vsyncpa [#allocation5], 1 }

</bundles_post_ra>
